<compile_context>
chip_gen: v6e
topology: v6e:2x2x1
jax: 0.10.0
libtpu: 0.0.40
codegen_flags: <defaults>
</compile_context>

<pallas_src>
import jax
import jax.numpy as jnp
from jax.experimental import pallas as pl
from jax.experimental.pallas import tpu as pltpu

LANE = 128
SUBLANE = 8
MAX_TILE_B = 2048


def _round_up(n, m):
    return (n + m - 1) // m * m


def _mlp_kernel(x_ref, w0_ref, b0_ref, w1_ref, b1_ref, w2_ref, b2_ref, out_ref):
    # Layer 0: bf16 MXU matmul, f32 accumulation; bias + tanh in f32.
    h = jnp.dot(x_ref[...], w0_ref[...], preferred_element_type=jnp.float32)
    h = jnp.tanh(h + b0_ref[...])
    # TODO(synk): Dropout(p=0.0) is identity here; p>0 training mode would need
    # a pltpu.prng_seed/prng_random_bits mask.
    # Layer 1
    h = jnp.dot(h.astype(jnp.bfloat16), w1_ref[...], preferred_element_type=jnp.float32)
    h = jnp.tanh(h + b1_ref[...])
    # Output layer (no activation); lane-dense padded columns.
    o = jnp.dot(h.astype(jnp.bfloat16), w2_ref[...], preferred_element_type=jnp.float32)
    out_ref[...] = (o + b2_ref[...]).astype(out_ref.dtype)


def categorical_mlp_logits(x, params, outsize, outwidth):
    """Forward pass; returns logits of shape (*x.shape[:-1], outsize, outwidth)."""
    (w0, b0), (w1, b1), (w2, b2) = params
    lead = x.shape[:-1]
    insize = x.shape[-1]
    h0 = w0.shape[1]
    h1 = w1.shape[1]
    out_dim = w2.shape[1]
    assert out_dim == outsize * outwidth

    xf = x.reshape(-1, insize)
    batch = xf.shape[0]

    # Batch tile: large tiles amortize per-step overhead; cap for small batches.
    tile_b = min(MAX_TILE_B, _round_up(batch, SUBLANE))
    b_pad = _round_up(batch, tile_b)
    if b_pad != batch:
        xf = jnp.pad(xf, ((0, b_pad - batch), (0, 0)))

    # Lane-dense output: pad final-layer columns to a multiple of 128 lanes.
    out_pad = _round_up(out_dim, LANE)
    w2p = jnp.pad(w2, ((0, 0), (0, out_pad - out_dim)))
    b2p = jnp.pad(b2, ((0, 0), (0, out_pad - out_dim)))

    # bf16 MXU operands (f32 accumulation inside the kernel); biases stay f32.
    xf_bf = xf.astype(jnp.bfloat16)
    w0b = w0.astype(jnp.bfloat16)
    w1b = w1.astype(jnp.bfloat16)
    w2b = w2p.astype(jnp.bfloat16)

    grid = (b_pad // tile_b,)
    const = lambda i: (0, 0)  # weights/biases: same block every step -> VMEM-resident

    cost = pl.CostEstimate(
        flops=2 * b_pad * (insize * h0 + h0 * h1 + h1 * out_pad),
        transcendentals=b_pad * (h0 + h1),
        bytes_accessed=(
            b_pad * insize * 2                       # bf16 x tiles in
            + b_pad * out_pad * 4                    # f32 logits out
            + (w0b.size + w1b.size + w2b.size) * 2   # bf16 weights
            + (b0.size + b1.size + b2p.size) * 4     # f32 biases
        ),
    )

    out_flat = pl.pallas_call(
        _mlp_kernel,
        out_shape=jax.ShapeDtypeStruct((b_pad, out_pad), jnp.float32),
        grid=grid,
        in_specs=[
            pl.BlockSpec((tile_b, insize), lambda i: (i, 0)),
            pl.BlockSpec((insize, h0), const),
            pl.BlockSpec((1, h0), const),
            pl.BlockSpec((h0, h1), const),
            pl.BlockSpec((1, h1), const),
            pl.BlockSpec((h1, out_pad), const),
            pl.BlockSpec((1, out_pad), const),
        ],
        out_specs=pl.BlockSpec((tile_b, out_pad), lambda i: (i, 0)),
        compiler_params=pltpu.CompilerParams(
            dimension_semantics=("parallel",)),
        cost_estimate=cost,
    )(xf_bf, w0b, b0, w1b, b1, w2b, b2p)

    logits = out_flat[:batch, :out_dim].reshape(*lead, outsize, outwidth)
    # TODO(synk): StraightThroughOneHotCategorical (distribution object +
    # straight-through sampling) has no Pallas equivalent; returning logits.
    return logits


def init_params(key, insize, hiddens, outsize, outwidth):
    """Deterministic nn.Linear-style init; weights stored as (in, out)."""
    sizes = [insize] + list(hiddens) + [outsize * outwidth]
    params = []
    for i in range(len(sizes) - 1):
        fan_in, fan_out = sizes[i], sizes[i + 1]
        key, kw, kb = jax.random.split(key, 3)
        bound = 1.0 / (fan_in ** 0.5)
        w = jax.random.uniform(kw, (fan_in, fan_out), jnp.float32, -bound, bound)
        # bias kept 2D (1, fan_out) for clean broadcast inside the kernel
        b = jax.random.uniform(kb, (1, fan_out), jnp.float32, -bound, bound)
        params.append((w, b))
    return params


if __name__ == "__main__":
    # Small shapes consistent with the module: insize=16, hiddens=(32, 32),
    # outsize=4, outwidth=8, batch=2.
    insize, hiddens, outsize, outwidth = 16, (32, 32), 4, 8
    batch = 2

    key = jax.random.PRNGKey(0)
    key, kx = jax.random.split(key)
    x = jax.random.normal(kx, (batch, insize), jnp.float32)

    params = init_params(key, insize, hiddens, outsize, outwidth)

    logits = categorical_mlp_logits(x, params, outsize, outwidth)
    jax.block_until_ready(logits)

    # Pure-JAX reference matching the kernel's bf16-operand / f32-accum matmuls.
    (w0, b0), (w1, b1), (w2, b2) = params
    h = jnp.tanh(jnp.dot(x.astype(jnp.bfloat16), w0.astype(jnp.bfloat16),
                         preferred_element_type=jnp.float32) + b0)
    h = jnp.tanh(jnp.dot(h.astype(jnp.bfloat16), w1.astype(jnp.bfloat16),
                         preferred_element_type=jnp.float32) + b1)
    ref = (jnp.dot(h.astype(jnp.bfloat16), w2.astype(jnp.bfloat16),
                   preferred_element_type=jnp.float32) + b2)
    ref = ref.reshape(batch, outsize, outwidth)

    assert logits.shape == (batch, outsize, outwidth), logits.shape
    assert jnp.allclose(logits, ref, atol=1e-3, rtol=1e-3), (
        float(jnp.max(jnp.abs(logits - ref))))
    print("KERNEL_OK")
</pallas_src>

<mosaic_0001>
module attributes {stable_mosaic.version = 11 : i64} {
  func.func @_mlp_kernel(%arg0: i32, %arg1: memref<8x16xbf16, #tpu.memory_space<vmem>>, %arg2: memref<16x32xbf16, #tpu.memory_space<vmem>>, %arg3: memref<1x32xf32, #tpu.memory_space<vmem>>, %arg4: memref<32x32xbf16, #tpu.memory_space<vmem>>, %arg5: memref<1x32xf32, #tpu.memory_space<vmem>>, %arg6: memref<32x128xbf16, #tpu.memory_space<vmem>>, %arg7: memref<1x128xf32, #tpu.memory_space<vmem>>, %arg8: memref<8x128xf32, #tpu.memory_space<vmem>>) attributes {dimension_semantics = [#tpu.dimension_semantics<parallel>], iteration_bounds = array<i64: 1>, scalar_prefetch = 0 : i64, scratch_operands = 0 : i64, tpu.core_type = #tpu.core_type<tc>, window_params = [{transform_indices = @transform_0, window_bounds = array<i64: 8, 16>}, {pipeline_mode = #tpu.pipeline_mode<synchronous>, transform_indices = @transform_1, window_bounds = array<i64: 16, 32>}, {pipeline_mode = #tpu.pipeline_mode<synchronous>, transform_indices = @transform_2, window_bounds = array<i64: 1, 32>}, {pipeline_mode = #tpu.pipeline_mode<synchronous>, transform_indices = @transform_3, window_bounds = array<i64: 32, 32>}, {pipeline_mode = #tpu.pipeline_mode<synchronous>, transform_indices = @transform_4, window_bounds = array<i64: 1, 32>}, {pipeline_mode = #tpu.pipeline_mode<synchronous>, transform_indices = @transform_5, window_bounds = array<i64: 32, 128>}, {pipeline_mode = #tpu.pipeline_mode<synchronous>, transform_indices = @transform_6, window_bounds = array<i64: 1, 128>}, {transform_indices = @transform_7, window_bounds = array<i64: 8, 128>}]} {
    %c0 = arith.constant 0 : index
    %c0_0 = arith.constant 0 : index
    %0 = vector.load %arg1[%c0, %c0_0] : memref<8x16xbf16, #tpu.memory_space<vmem>>, vector<8x16xbf16>
    %c0_1 = arith.constant 0 : index
    %c0_2 = arith.constant 0 : index
    %1 = vector.load %arg2[%c0_1, %c0_2] : memref<16x32xbf16, #tpu.memory_space<vmem>>, vector<16x32xbf16>
    %cst = arith.constant dense<0.000000e+00> : vector<8x32xf32>
    %2 = tpu.matmul %0, %1, %cst {dimension_numbers = #tpu.dot_dimension_numbers<[1], [0], [0], [1], [0, 0, 1, 1], [], []>} : vector<8x16xbf16>, vector<16x32xbf16>, vector<8x32xf32> -> vector<8x32xf32>
    %c0_3 = arith.constant 0 : index
    %c0_4 = arith.constant 0 : index
    %3 = vector.load %arg3[%c0_3, %c0_4] : memref<1x32xf32, #tpu.memory_space<vmem>>, vector<1x32xf32>
    %4 = vector.broadcast %3 : vector<1x32xf32> to vector<8x32xf32>
    %5 = arith.addf %2, %4 : vector<8x32xf32>
    %6 = math.tanh %5 : vector<8x32xf32>
    %7 = arith.truncf %6 : vector<8x32xf32> to vector<8x32xbf16>
    %c0_5 = arith.constant 0 : index
    %c0_6 = arith.constant 0 : index
    %8 = vector.load %arg4[%c0_5, %c0_6] : memref<32x32xbf16, #tpu.memory_space<vmem>>, vector<32x32xbf16>
    %cst_7 = arith.constant dense<0.000000e+00> : vector<8x32xf32>
    %9 = tpu.matmul %7, %8, %cst_7 {dimension_numbers = #tpu.dot_dimension_numbers<[1], [0], [0], [1], [0, 0, 1, 1], [], []>} : vector<8x32xbf16>, vector<32x32xbf16>, vector<8x32xf32> -> vector<8x32xf32>
    %c0_8 = arith.constant 0 : index
    %c0_9 = arith.constant 0 : index
    %10 = vector.load %arg5[%c0_8, %c0_9] : memref<1x32xf32, #tpu.memory_space<vmem>>, vector<1x32xf32>
    %11 = vector.broadcast %10 : vector<1x32xf32> to vector<8x32xf32>
    %12 = arith.addf %9, %11 : vector<8x32xf32>
    %13 = math.tanh %12 : vector<8x32xf32>
    %14 = arith.truncf %13 : vector<8x32xf32> to vector<8x32xbf16>
    %c0_10 = arith.constant 0 : index
    %c0_11 = arith.constant 0 : index
    %15 = vector.load %arg6[%c0_10, %c0_11] : memref<32x128xbf16, #tpu.memory_space<vmem>>, vector<32x128xbf16>
    %cst_12 = arith.constant dense<0.000000e+00> : vector<8x128xf32>
    %16 = tpu.matmul %14, %15, %cst_12 {dimension_numbers = #tpu.dot_dimension_numbers<[1], [0], [0], [1], [0, 0, 1, 1], [], []>} : vector<8x32xbf16>, vector<32x128xbf16>, vector<8x128xf32> -> vector<8x128xf32>
    %c0_13 = arith.constant 0 : index
    %c0_14 = arith.constant 0 : index
    %17 = vector.load %arg7[%c0_13, %c0_14] : memref<1x128xf32, #tpu.memory_space<vmem>>, vector<1x128xf32>
    %18 = vector.broadcast %17 : vector<1x128xf32> to vector<8x128xf32>
    %19 = arith.addf %16, %18 : vector<8x128xf32>
    %c0_15 = arith.constant 0 : index
    %c0_16 = arith.constant 0 : index
    %20 = vector.load %arg8[%c0_15, %c0_16] : memref<8x128xf32, #tpu.memory_space<vmem>>, vector<8x128xf32>
    tpu.vector_store %arg8[%c0_15, %c0_16], %19 {strides = array<i32>} : memref<8x128xf32, #tpu.memory_space<vmem>>, vector<8x128xf32>,
    return
  }
  func.func @transform_0(%arg0: i32) -> (i32, i32) {
    %c0_i32 = arith.constant 0 : i32
    %c0_i32_0 = arith.constant 0 : i32
    return %arg0, %c0_i32 : i32, i32
  }
  func.func @transform_1(%arg0: i32) -> (i32, i32) {
    %c0_i32 = arith.constant 0 : i32
    %c0_i32_0 = arith.constant 0 : i32
    %c0_i32_1 = arith.constant 0 : i32
    return %c0_i32, %c0_i32_0 : i32, i32
  }
  func.func @transform_2(%arg0: i32) -> (i32, i32) {
    %c0_i32 = arith.constant 0 : i32
    %c0_i32_0 = arith.constant 0 : i32
    %c0_i32_1 = arith.constant 0 : i32
    return %c0_i32, %c0_i32_0 : i32, i32
  }
  func.func @transform_3(%arg0: i32) -> (i32, i32) {
    %c0_i32 = arith.constant 0 : i32
    %c0_i32_0 = arith.constant 0 : i32
    %c0_i32_1 = arith.constant 0 : i32
    return %c0_i32, %c0_i32_0 : i32, i32
  }
  func.func @transform_4(%arg0: i32) -> (i32, i32) {
    %c0_i32 = arith.constant 0 : i32
    %c0_i32_0 = arith.constant 0 : i32
    %c0_i32_1 = arith.constant 0 : i32
    return %c0_i32, %c0_i32_0 : i32, i32
  }
  func.func @transform_5(%arg0: i32) -> (i32, i32) {
    %c0_i32 = arith.constant 0 : i32
    %c0_i32_0 = arith.constant 0 : i32
    %c0_i32_1 = arith.constant 0 : i32
    return %c0_i32, %c0_i32_0 : i32, i32
  }
  func.func @transform_6(%arg0: i32) -> (i32, i32) {
    %c0_i32 = arith.constant 0 : i32
    %c0_i32_0 = arith.constant 0 : i32
    %c0_i32_1 = arith.constant 0 : i32
    return %c0_i32, %c0_i32_0 : i32, i32
  }
  func.func @transform_7(%arg0: i32) -> (i32, i32) {
    %c0_i32 = arith.constant 0 : i32
    %c0_i32_0 = arith.constant 0 : i32
    return %arg0, %c0_i32 : i32, i32
  }
}

</mosaic_0001>

<bundles_post_ra>
// kernel: tpu_custom_call.1
= control target key start
LH: loop header
LB: loop body
LE: loop exit
PB: predicated region body
PF: predicated region fallthrough
CT: control target
= control target key end

     0   :  { %12 = vsyncpa [#allocation3], 0  ;;  %s547_s0 = inlined_call_operand.hbm [shape: bf16[8,16], index: 0, kind: input, shape index: {}]   ;;  %s548_s1 = inlined_call_operand.hbm [shape: bf16[16,32], index: 1, kind: input, shape index: {}]   ;;  %s549_s2 = inlined_call_operand.vmem [shape: f32[1,32], index: 2, kind: input, shape index: {}]   ;;  %s550_s3 = inlined_call_operand.hbm [shape: bf16[32,32], index: 3, kind: input, shape index: {}]   ;;  %s551_s4 = inlined_call_operand.vmem [shape: f32[1,32], index: 4, kind: input, shape index: {}]   ;;  %s552_s5 = inlined_call_operand.hbm [shape: bf16[32,128], index: 5, kind: input, shape index: {}]   ;;  %s553_s6 = inlined_call_operand.vmem [shape: f32[1,128], index: 6, kind: input, shape index: {}]   ;;  %s554_s7 = inlined_call_operand.hbm [shape: f32[8,128], index: 7, kind: output, shape index: {}]  }
   0x1   :  { %13 = vsyncpa [#allocation6], 0 }
   0x2   :  { %14 = vsyncpa [#allocation9], 0 }
   0x3   :  { %15 = vsyncpa [#allocation4], 0  ;;  %s463_s24 = smov [#allocation5]  }
   0x4   :  { %s31_s25 = sshll.u32 %s463_s24, 4  ;;  %s32_s25 = int_to_ptr.vmem [resolvable:$true] %s31_s25 }
   0x5   :  { %s363_s26 = scalar_lea.vmem %s32_s25, 128  ;;  %p368_p1 = scmp.lt.s32.totalorder %s32_s25, %s32_s25 }
   0x6   :  { %p364_p0 = scmp.ne.s32.totalorder %s32_s25, %s363_s26  ;;  %p369_p2 = scmp.lt.s32.totalorder %s363_s26, %s363_s26 }
   0x8   :  { %p370_p3 = por %p369_p2, %p368_p1 }
   0xa   :  { %p371_p4 = pnand %p370_p3, %p364_p0 }
   0xc   :  { %374 = shalt.err (!%p371_p4)
}
   0xd   :  { %s464_s27 = smov 64   ;;  %s465_s28 = smov 4  }
   0xe   :  { %37 = dma.hbm_to_vmem [thread:$0]  %s548_s1, 128, %s32_s25, [#allocation6], %s464_s27, %s464_s27, %s465_s28  }
   0xf   :  { %s466_s8 = smov [#allocation2]   ;;  %s467_s10 = smov [#allocation7]  }
  0x10   :  { %s22_s9 = sshll.u32 %s466_s8, 4  ;;  %s45_s11 = sshll.u32 %s467_s10, 4  ;;  %s23_s9 = int_to_ptr.vmem [resolvable:$true] %s22_s9  ;;  %s46_s11 = int_to_ptr.vmem [resolvable:$true] %s45_s11 }
  0x11   :  { %s383_s12 = scalar_lea.vmem %s23_s9, 64  ;;  %p388_p6 = scmp.lt.s32.totalorder %s23_s9, %s23_s9 }
  0x12   :  { %p384_p5 = scmp.ne.s32.totalorder %s23_s9, %s383_s12  ;;  %p389_p7 = scmp.lt.s32.totalorder %s383_s12, %s383_s12 }
  0x14   :  { %p390_p8 = por %p389_p7, %p388_p6 }
  0x16   :  { %p391_p9 = pnand %p390_p8, %p384_p5 }
  0x18   :  { %394 = shalt.err (!%p391_p9)
}
  0x19   :  { %25 = dma.hbm_to_vmem [thread:$0]  %s547_s0, 64, %s23_s9, [#allocation3]  }
  0x1a   :  { %s403_s15 = scalar_lea.vmem %s46_s11, 256  ;;  %p408_p11 = scmp.lt.s32.totalorder %s46_s11, %s46_s11 }
  0x1b   :  { %p404_p10 = scmp.ne.s32.totalorder %s46_s11, %s403_s15  ;;  %p409_p12 = scmp.lt.s32.totalorder %s403_s15, %s403_s15 }
  0x1d   :  { %p410_p13 = por %p409_p12, %p408_p11 }
  0x1f   :  { %p411_p0 = pnand %p410_p13, %p404_p10 }
  0x21   :  { %414 = shalt.err (!%p411_p0)
}
  0x22   :  { %51 = dma.hbm_to_vmem [thread:$0]  %s550_s3, 256, %s46_s11, [#allocation6], %s464_s27, %s464_s27, %s465_s28  }
  0x23   :  { %s468_s17 = smov [#allocation8]  }
  0x24   :  { %s59_s18 = sshll.u32 %s468_s17, 4  ;;  %s60_s18 = int_to_ptr.vmem [resolvable:$true] %s59_s18 }
  0x25   :  { %s423_s19 = scalar_lea.vmem %s60_s18, 256  ;;  %p428_p2 = scmp.lt.s32.totalorder %s60_s18, %s60_s18 }
  0x26   :  { %p424_p1 = scmp.ne.s32.totalorder %s60_s18, %s423_s19  ;;  %p429_p3 = scmp.lt.s32.totalorder %s423_s19, %s423_s19 }
  0x28   :  { %p430_p4 = por %p429_p3, %p428_p2 }
  0x2a   :  { %p431_p5 = pnand %p430_p4, %p424_p1 }
  0x2c   :  { %434 = shalt.err (!%p431_p5)
}
  0x2d   :  { %65 = dma.hbm_to_vmem [thread:$0]  %s552_s5, 256, %s60_s18, [#allocation9], %s464_s27, %s464_s27, %s465_s28  }
  0x2e   :  { %455 = dma.done.wait [#allocation3], 64  }
  0x2f   :  { %456 = vsyncadd [#allocation3], 4294967232 }
  0x30   :  { %457 = dma.done.wait [#allocation6], 384  }
  0x31   :  { %458 = vsyncadd [#allocation6], 4294966912 }
  0x32   :  { %459 = dma.done.wait [#allocation9], 256  }
  0x33   :  { %460 = vsyncadd [#allocation9], 4294967040  ;;  %v469_v0 = vmov 0.0   ;;  %vm470_vm0 = vmmov 0   ;;  %v346_v1 = vld [vmem:[#allocation5] sm:$0xff]   ;;  %vm97_vm1 = vcmask 130048  }
  0x34   :  { %315 = vmatprep.subr.bf16.mxu0 %v469_v0  ;;  %317 = vmatprep.mubr.msk.bf16.mxu0 %vm470_vm0, %v469_v0  ;;  %v81_v2 = vld [vmem:[#allocation2] sm:$0xf]  ;;  %v347_v3 = vld [vmem:[#allocation7 + $0x8] sm:$0xff]   ;;  %v348_v4 = vld [vmem:[#allocation7] sm:$0xff]   ;;  %vm166_vm2 = vcmask 261120   ;;  %s471_s24 = smov [#allocation10]  }
  0x35   :  { %321 = vmatprep.subr.bf16.mxu1 %v469_v0  ;;  %325 = vmatprep.mubr.msk.bf16.mxu1 %vm470_vm0, %v469_v0  ;;  %v296_v5 = vld [vmem:[%s549_s2] ss:$0 sm:$0xff]  ;;  %v349_v13 = vld [vmem:[#allocation8 + $0x8] sm:$0xff]   ;;  %s285_s25 = sshll.u32 %s471_s24, 4  ;;  %s286_s25 = int_to_ptr.vmem [resolvable:$true] %s285_s25 }
  0x36   :  { %316 = vmatpush3.bf16.msra.mxu0 %v346_v1  ;;  %322 = vmatpush3.bf16.msra.mxu1 %v347_v3  ;;  %v350_v14 = vld [vmem:[#allocation8] sm:$0xff]   ;;  %p440_p7 = scmp.lt.s32.totalorder %s286_s25, %s286_s25 }
  0x37   :  { %329 = vmatprep.subr.bf16.mxu0 %v469_v0  ;;  %323 = vmatprep.subr.bf16.mxu1 %v469_v0  ;;  %v299_v15 = vld [vmem:[%s551_s4] ss:$0 sm:$0xff]  ;;  %s435_s4 = scalar_lea.vmem %s286_s25, 128 }
  0x38   :  { %v303_v23 = vld [vmem:[%s553_s6] ss:$0 sm:$0xff]  ;;  %p436_p6 = scmp.ne.s32.totalorder %s286_s25, %s435_s4  ;;  %p441_p8 = scmp.lt.s32.totalorder %s435_s4, %s435_s4 }
  0x39   :  { %318 = vmatmul.mubr.msk.bf16.vlgmr.msra.gmra.mxu0 %vm97_vm1, %v81_v2 }
  0x3a   :  { %333 = vmatprep.mubr.msk.bf16.mxu0 %vm470_vm0, %v469_v0  ;;  %324 = vmatpush3.bf16.msra.mxu1 %v348_v4  ;;  %p442_p9 = por %p441_p8, %p440_p7 }
  0x3b   :  { %330 = vmatpush3.bf16.msra.mxu0 %v349_v13 }
  0x3c   :  { %331 = vmatprep.subr.bf16.mxu0 %v469_v0  ;;  %p443_p10 = pnand %p442_p9, %p436_p6 }
  0x3f   :  { %332 = vmatpush3.bf16.msra.mxu0 %v350_v14 }
  0xf9   :  { %v135_v6 = vpop.f32.mrf.mxu0 }
  0xfa   :  { %v136_v7 = vadd.f32 %v296_v5, %v135_v6 }
  0xfb   :  { %v319_v8 = vpop.f32.mrf.mxu0 }
  0xfc   :  { %351 = vtanh.f32 %v136_v7 }
  0xfd   :  { %v138_v9 = vpop.f32.mrf.mxu0 }
  0xff   :  { %v320_v10 = vpop.f32.mrf.mxu0 }
 0x109   :  { %v352_v11 = vpop.eup %351 }
 0x10a   :  { %v142_v12 = vpack.c.bf16 %v352_v11, %v352_v11 }
 0x10c   :  { %326 = vmatmul.mubr.msk.bf16.vlgmr.msra.gmra.mxu1 %vm166_vm2, %v142_v12 }
 0x1cc   :  { %v204_v16 = vpop.f32.mrf.mxu1 }
 0x1cd   :  { %v205_v17 = vadd.f32 %v299_v15, %v204_v16 }
 0x1ce   :  { %v327_v18 = vpop.f32.mrf.mxu1 }
 0x1cf   :  { %353 = vtanh.f32 %v205_v17 }
 0x1d0   :  { %v207_v19 = vpop.f32.mrf.mxu1 }
 0x1d2   :  { %v328_v20 = vpop.f32.mrf.mxu1 }
 0x1dc   :  { %v354_v21 = vpop.eup %353 }
 0x1dd   :  { %v211_v22 = vpack.c.bf16 %v354_v21, %v354_v21 }
 0x1df   :  { %334 = vmatmul.mubr.msk.bf16.vlgmr.msra.gmra.mxu0 %vm166_vm2, %v211_v22 }
 0x29f   :  { %v272_v24 = vpop.f32.mrf.mxu0 }
 0x2a0   :  { %v273_v25 = vadd.f32 %v303_v23, %v272_v24 }
 0x2a1   :  { %v335_v26 = vpop.f32.mrf.mxu0 }
 0x2a2   :  { %278 = vst [vmem:[#allocation10] sm:$0xff] %v273_v25 }
 0x2a3   :  { %v275_v27 = vpop.f32.mrf.mxu0 }
 0x2a4   :  { %446 = shalt.err (!%p443_p10)
}
 0x2a5   :  { %288 = dma.vmem_to_hbm [thread:$0]  %s286_s25, 128, %s554_s7, [#allocation4]   ;;  %v336_v28 = vpop.f32.mrf.mxu0 }
 0x2a6   :  { %461 = dma.done.wait [#allocation4], 128  }
 0x2a7   :  { %462 = vsyncadd [#allocation4], 4294967168 }
 0x2a8   :  { %292 = vsyncpa [#allocation3], 1 }
 0x2a9   :  { %293 = vsyncpa [#allocation6], 1 }
 0x2aa   :  { %294 = vsyncpa [#allocation9], 1 }
 0x2ab   :  { %295 = vsyncpa [#allocation4], 1 }

</bundles_post_ra>
